<compile_context>
chip_gen: v5e
topology: v5e:2x2
jax: 0.10.0
libtpu: 0.0.40
codegen_flags: <defaults>
</compile_context>

<pallas_src>
import jax
import jax.numpy as jnp
from jax import lax
from jax.experimental import pallas as pl
from jax.experimental.pallas import tpu as pltpu


def _cdiv(a, b):
    return (a + b - 1) // b


def _round_up(a, b):
    return _cdiv(a, b) * b


def _pick_tile(B, D, itemsize, budget_bytes):
    """Largest lane-aligned (multiple-of-128) column chunk fitting the budget."""
    t = budget_bytes // max(B * itemsize, 1)
    t = max(128, (t // 128) * 128)
    t = min(t, _round_up(D, 128))
    return t


def _make_kernel(B, D1, D2, t1, t2, n1, n2, grid_n, scale):
    need_mask1 = (D1 % t1) != 0
    need_mask2 = (D2 % t2) != 0

    def kernel(a_ref, b_ref, out_ref, g1_ref, g2_ref):
        i = pl.program_id(0)

        @pl.when(i == 0)
        def _():
            g1_ref[...] = jnp.zeros_like(g1_ref)
            g2_ref[...] = jnp.zeros_like(g2_ref)

        def accumulate(x_ref, g_ref, t, D, need_mask):
            x = x_ref[...]                                  # (B, t), native dtype
            if need_mask:
                # Edge chunk: zero columns past the true feature dim (block
                # region past the array end is undefined, so select, not mul).
                col = lax.broadcasted_iota(jnp.int32, x.shape, 1) + i * t
                x = jnp.where(col < D, x, jnp.zeros_like(x))
            # G += X X^T, contracting over the (large) feature chunk on the MXU.
            g_ref[...] += lax.dot_general(
                x, x,
                dimension_numbers=(((1,), (1,)), ((), ())),
                preferred_element_type=jnp.float32,
            )

        if n1 == grid_n:
            accumulate(a_ref, g1_ref, t1, D1, need_mask1)
        else:
            @pl.when(i < n1)
            def _():
                accumulate(a_ref, g1_ref, t1, D1, need_mask1)

        if n2 == grid_n:
            accumulate(b_ref, g2_ref, t2, D2, need_mask2)
        else:
            @pl.when(i < n2)
            def _():
                accumulate(b_ref, g2_ref, t2, D2, need_mask2)

        @pl.when(i == grid_n - 1)
        def _():
            g1 = g1_ref[...]                                # (B, B) f32
            g2 = g2_ref[...]

            eye = (lax.broadcasted_iota(jnp.int32, (B, B), 0)
                   == lax.broadcasted_iota(jnp.int32, (B, B), 1))
            zero = jnp.zeros((B, B), jnp.float32)

            # Row norms squared are the Gram diagonals; extract them both as a
            # column and as a row (axis-1 / axis-0 reductions) to avoid an
            # in-kernel transpose when forming the outer-product scaling.
            d1c = jnp.sum(jnp.where(eye, g1, zero), axis=1, keepdims=True)   # (B,1)
            d1r = jnp.sum(jnp.where(eye, g1, zero), axis=0, keepdims=True)   # (1,B)
            d2c = jnp.sum(jnp.where(eye, g2, zero), axis=1, keepdims=True)
            d2r = jnp.sum(jnp.where(eye, g2, zero), axis=0, keepdims=True)

            s1 = (1.0 / (jnp.sqrt(d1c) + 1e-6)) * (1.0 / (jnp.sqrt(d1r) + 1e-6))
            s2 = (1.0 / (jnp.sqrt(d2c) + 1e-6)) * (1.0 / (jnp.sqrt(d2r) + 1e-6))

            g1n = g1 * s1
            g2n = g2 * s2
            out_ref[...] = jnp.sum(g1n * g2n, axis=(0, 1), keepdims=True) * scale

    return kernel


def diff_loss(input1, input2, *, chunk_budget_bytes=2 << 20):
    """Pallas implementation of DiffLoss.forward(input1, input2)."""
    B = input1.shape[0]
    # Keep native dtype through the DMA (bf16 streams half the bytes); the MXU
    # accumulates in f32 via preferred_element_type.
    a = input1.reshape(B, -1)
    b = input2.reshape(B, -1)
    D1 = a.shape[1]
    D2 = b.shape[1]

    # Per-array chunk width: lane-aligned, as large as the per-buffer VMEM
    # budget allows (fewer grid steps), never larger than the padded feature
    # dim.  With 2x pipeline buffers for each of the two inputs this stays
    # well inside the default scoped-VMEM limit on v5e / v6e / v7x.
    t1 = _pick_tile(B, D1, a.dtype.itemsize, chunk_budget_bytes)
    t2 = _pick_tile(B, D2, b.dtype.itemsize, chunk_budget_bytes)
    n1 = _cdiv(D1, t1)
    n2 = _cdiv(D2, t2)
    grid_n = max(n1, n2)

    scale = 1.0 / float(D1 * D2)
    kernel = _make_kernel(B, D1, D2, t1, t2, n1, n2, grid_n, scale)

    if n1 == grid_n:
        a_map = lambda i: (0, i)
    else:
        # Clamp: once this input is exhausted, re-reference the last block
        # (same block index => no new DMA) and skip compute via pl.when.
        a_map = lambda i: (0, jnp.minimum(i, n1 - 1))
    if n2 == grid_n:
        b_map = lambda i: (0, i)
    else:
        b_map = lambda i: (0, jnp.minimum(i, n2 - 1))

    out = pl.pallas_call(
        kernel,
        out_shape=jax.ShapeDtypeStruct((1, 1), jnp.float32),
        grid=(grid_n,),
        in_specs=[
            pl.BlockSpec((B, t1), a_map),   # column chunk of input1
            pl.BlockSpec((B, t2), b_map),   # column chunk of input2
        ],
        out_specs=pl.BlockSpec((1, 1), lambda i: (0, 0)),
        scratch_shapes=[
            pltpu.VMEM((B, B), jnp.float32),   # G1 = A A^T accumulator
            pltpu.VMEM((B, B), jnp.float32),   # G2 = B B^T accumulator
        ],
        compiler_params=pltpu.CompilerParams(
            dimension_semantics=("arbitrary",),   # reduction over feature chunks
        ),
    )(a, b)

    return out[0, 0]


def _diff_loss_ref(input1, input2):
    B = input1.shape[0]
    a = input1.reshape(B, -1).astype(jnp.float32)
    b = input2.reshape(B, -1).astype(jnp.float32)
    a_l2 = a / (jnp.linalg.norm(a, axis=1, keepdims=True) + 1e-6)
    b_l2 = b / (jnp.linalg.norm(b, axis=1, keepdims=True) + 1e-6)
    return jnp.mean((a_l2.T @ b_l2) ** 2)


if __name__ == "__main__":
    key = jax.random.PRNGKey(0)
    k1, k2 = jax.random.split(key)
    # Two feature maps, NCHW-shaped as the module would receive them.
    x1 = jax.random.normal(k1, (2, 4, 16, 16), dtype=jnp.float32)
    x2 = jax.random.normal(k2, (2, 4, 16, 16), dtype=jnp.float32)

    loss = jax.block_until_ready(diff_loss(x1, x2))
    ref = jax.block_until_ready(_diff_loss_ref(x1, x2))

    assert jnp.allclose(loss, ref, rtol=1e-4, atol=1e-6), (loss, ref)
    print("KERNEL_OK")
</pallas_src>

<mosaic_0001>
module attributes {stable_mosaic.version = 11 : i64} {
  func.func @kernel(%arg0: i32, %arg1: memref<2x1024xf32, #tpu.memory_space<vmem>>, %arg2: memref<2x1024xf32, #tpu.memory_space<vmem>>, %arg3: memref<1x1xf32, #tpu.memory_space<vmem>>, %arg4: memref<2x2xf32, #tpu.memory_space<vmem>>, %arg5: memref<2x2xf32, #tpu.memory_space<vmem>>) attributes {dimension_semantics = [#tpu.dimension_semantics<arbitrary>], iteration_bounds = array<i64: 1>, scalar_prefetch = 0 : i64, scratch_operands = 2 : i64, tpu.core_type = #tpu.core_type<tc>, window_params = [{transform_indices = @transform_0, window_bounds = array<i64: 2, 1024>}, {transform_indices = @transform_1, window_bounds = array<i64: 2, 1024>}, {pipeline_mode = #tpu.pipeline_mode<synchronous>, transform_indices = @transform_2, window_bounds = array<i64: 1, 1>}]} {
    %c0_i32 = arith.constant 0 : i32
    %0 = arith.cmpi eq, %arg0, %c0_i32 : i32
    %1 = arith.extui %0 : i1 to i32
    %c0_i32_0 = arith.constant 0 : i32
    %2 = arith.cmpi ne, %1, %c0_i32_0 : i32
    scf.if %2 {
      %cst_15 = arith.constant 0.000000e+00 : f32
      %16 = vector.broadcast %cst_15 : f32 to vector<2x2xf32>
      %c0_16 = arith.constant 0 : index
      %c0_17 = arith.constant 0 : index
      %17 = vector.load %arg4[%c0_16, %c0_17] : memref<2x2xf32, #tpu.memory_space<vmem>>, vector<2x2xf32>
      tpu.vector_store %arg4[%c0_16, %c0_17], %16 {strides = array<i32>} : memref<2x2xf32, #tpu.memory_space<vmem>>, vector<2x2xf32>,
      %cst_18 = arith.constant 0.000000e+00 : f32
      %18 = vector.broadcast %cst_18 : f32 to vector<2x2xf32>
      %c0_19 = arith.constant 0 : index
      %c0_20 = arith.constant 0 : index
      %19 = vector.load %arg5[%c0_19, %c0_20] : memref<2x2xf32, #tpu.memory_space<vmem>>, vector<2x2xf32>
      tpu.vector_store %arg5[%c0_19, %c0_20], %18 {strides = array<i32>} : memref<2x2xf32, #tpu.memory_space<vmem>>, vector<2x2xf32>,
    } else {
    }
    %c0 = arith.constant 0 : index
    %c0_1 = arith.constant 0 : index
    %3 = vector.load %arg1[%c0, %c0_1] : memref<2x1024xf32, #tpu.memory_space<vmem>>, vector<2x1024xf32>
    %c0_2 = arith.constant 0 : index
    %c0_3 = arith.constant 0 : index
    %4 = vector.load %arg4[%c0_2, %c0_3] : memref<2x2xf32, #tpu.memory_space<vmem>>, vector<2x2xf32>
    %cst = arith.constant dense<0.000000e+00> : vector<2x2xf32>
    %5 = tpu.matmul %3, %3, %cst {dimension_numbers = #tpu.dot_dimension_numbers<[1], [1], [0], [0], [0, 0, 1, 0], [], []>} : vector<2x1024xf32>, vector<2x1024xf32>, vector<2x2xf32> -> vector<2x2xf32>
    %6 = arith.addf %4, %5 : vector<2x2xf32>
    %c0_4 = arith.constant 0 : index
    %c0_5 = arith.constant 0 : index
    %7 = vector.load %arg4[%c0_4, %c0_5] : memref<2x2xf32, #tpu.memory_space<vmem>>, vector<2x2xf32>
    tpu.vector_store %arg4[%c0_4, %c0_5], %6 {strides = array<i32>} : memref<2x2xf32, #tpu.memory_space<vmem>>, vector<2x2xf32>,
    %c0_6 = arith.constant 0 : index
    %c0_7 = arith.constant 0 : index
    %8 = vector.load %arg2[%c0_6, %c0_7] : memref<2x1024xf32, #tpu.memory_space<vmem>>, vector<2x1024xf32>
    %c0_8 = arith.constant 0 : index
    %c0_9 = arith.constant 0 : index
    %9 = vector.load %arg5[%c0_8, %c0_9] : memref<2x2xf32, #tpu.memory_space<vmem>>, vector<2x2xf32>
    %cst_10 = arith.constant dense<0.000000e+00> : vector<2x2xf32>
    %10 = tpu.matmul %8, %8, %cst_10 {dimension_numbers = #tpu.dot_dimension_numbers<[1], [1], [0], [0], [0, 0, 1, 0], [], []>} : vector<2x1024xf32>, vector<2x1024xf32>, vector<2x2xf32> -> vector<2x2xf32>
    %11 = arith.addf %9, %10 : vector<2x2xf32>
    %c0_11 = arith.constant 0 : index
    %c0_12 = arith.constant 0 : index
    %12 = vector.load %arg5[%c0_11, %c0_12] : memref<2x2xf32, #tpu.memory_space<vmem>>, vector<2x2xf32>
    tpu.vector_store %arg5[%c0_11, %c0_12], %11 {strides = array<i32>} : memref<2x2xf32, #tpu.memory_space<vmem>>, vector<2x2xf32>,
    %c0_i32_13 = arith.constant 0 : i32
    %13 = arith.cmpi eq, %arg0, %c0_i32_13 : i32
    %14 = arith.extui %13 : i1 to i32
    %c0_i32_14 = arith.constant 0 : i32
    %15 = arith.cmpi ne, %14, %c0_i32_14 : i32
    scf.if %15 {
      %c0_15 = arith.constant 0 : index
      %c0_16 = arith.constant 0 : index
      %16 = vector.load %arg4[%c0_15, %c0_16] : memref<2x2xf32, #tpu.memory_space<vmem>>, vector<2x2xf32>
      %c0_17 = arith.constant 0 : index
      %c0_18 = arith.constant 0 : index
      %17 = vector.load %arg5[%c0_17, %c0_18] : memref<2x2xf32, #tpu.memory_space<vmem>>, vector<2x2xf32>
      %18 = tpu.iota {dimensions = array<i32: 0>} : vector<2x2xi32>
      %19 = tpu.iota {dimensions = array<i32: 1>} : vector<2x2xi32>
      %20 = arith.cmpi eq, %18, %19 : vector<2x2xi32>
      %cst_19 = arith.constant 0.000000e+00 : f32
      %21 = vector.broadcast %cst_19 : f32 to vector<2x2xf32>
      %22 = arith.select %20, %16, %21 : vector<2x2xi1>, vector<2x2xf32>
      %cst_20 = arith.constant dense<0.000000e+00> : vector<2xf32>
      %23 = vector.multi_reduction <add>, %22, %cst_20 [1] : vector<2x2xf32> to vector<2xf32>
      %24 = vector.shape_cast %23 : vector<2xf32> to vector<2x1xf32>
      %25 = arith.select %20, %16, %21 : vector<2x2xi1>, vector<2x2xf32>
      %cst_21 = arith.constant dense<0.000000e+00> : vector<2xf32>
      %26 = vector.multi_reduction <add>, %25, %cst_21 [0] : vector<2x2xf32> to vector<2xf32>
      %27 = vector.shape_cast %26 : vector<2xf32> to vector<1x2xf32>
      %28 = arith.select %20, %17, %21 : vector<2x2xi1>, vector<2x2xf32>
      %cst_22 = arith.constant dense<0.000000e+00> : vector<2xf32>
      %29 = vector.multi_reduction <add>, %28, %cst_22 [1] : vector<2x2xf32> to vector<2xf32>
      %30 = vector.shape_cast %29 : vector<2xf32> to vector<2x1xf32>
      %31 = arith.select %20, %17, %21 : vector<2x2xi1>, vector<2x2xf32>
      %cst_23 = arith.constant dense<0.000000e+00> : vector<2xf32>
      %32 = vector.multi_reduction <add>, %31, %cst_23 [0] : vector<2x2xf32> to vector<2xf32>
      %33 = vector.shape_cast %32 : vector<2xf32> to vector<1x2xf32>
      %34 = math.sqrt %24 : vector<2x1xf32>
      %cst_24 = arith.constant 9.99999997E-7 : f32
      %35 = vector.broadcast %cst_24 : f32 to vector<2x1xf32>
      %36 = arith.addf %34, %35 : vector<2x1xf32>
      %cst_25 = arith.constant 1.000000e+00 : f32
      %37 = vector.broadcast %cst_25 : f32 to vector<2x1xf32>
      %38 = arith.divf %37, %36 : vector<2x1xf32>
      %39 = math.sqrt %27 : vector<1x2xf32>
      %cst_26 = arith.constant 9.99999997E-7 : f32
      %40 = vector.broadcast %cst_26 : f32 to vector<1x2xf32>
      %41 = arith.addf %39, %40 : vector<1x2xf32>
      %cst_27 = arith.constant 1.000000e+00 : f32
      %42 = vector.broadcast %cst_27 : f32 to vector<1x2xf32>
      %43 = arith.divf %42, %41 : vector<1x2xf32>
      %44 = vector.broadcast %38 : vector<2x1xf32> to vector<2x2xf32>
      %45 = vector.broadcast %43 : vector<1x2xf32> to vector<2x2xf32>
      %46 = arith.mulf %44, %45 : vector<2x2xf32>
      %47 = math.sqrt %30 : vector<2x1xf32>
      %cst_28 = arith.constant 9.99999997E-7 : f32
      %48 = vector.broadcast %cst_28 : f32 to vector<2x1xf32>
      %49 = arith.addf %47, %48 : vector<2x1xf32>
      %cst_29 = arith.constant 1.000000e+00 : f32
      %50 = vector.broadcast %cst_29 : f32 to vector<2x1xf32>
      %51 = arith.divf %50, %49 : vector<2x1xf32>
      %52 = math.sqrt %33 : vector<1x2xf32>
      %cst_30 = arith.constant 9.99999997E-7 : f32
      %53 = vector.broadcast %cst_30 : f32 to vector<1x2xf32>
      %54 = arith.addf %52, %53 : vector<1x2xf32>
      %cst_31 = arith.constant 1.000000e+00 : f32
      %55 = vector.broadcast %cst_31 : f32 to vector<1x2xf32>
      %56 = arith.divf %55, %54 : vector<1x2xf32>
      %57 = vector.broadcast %51 : vector<2x1xf32> to vector<2x2xf32>
      %58 = vector.broadcast %56 : vector<1x2xf32> to vector<2x2xf32>
      %59 = arith.mulf %57, %58 : vector<2x2xf32>
      %60 = arith.mulf %16, %46 : vector<2x2xf32>
      %61 = arith.mulf %17, %59 : vector<2x2xf32>
      %62 = arith.mulf %60, %61 : vector<2x2xf32>
      %63 = vector.shape_cast %62 : vector<2x2xf32> to vector<1x2x2xf32>
      %cst_32 = arith.constant dense<0.000000e+00> : vector<1xf32>
      %64 = vector.multi_reduction <add>, %63, %cst_32 [1, 2] : vector<1x2x2xf32> to vector<1xf32>
      %65 = vector.shape_cast %64 : vector<1xf32> to vector<1x1x1xf32>
      %66 = vector.extract %65[0, 0, 0] : f32 from vector<1x1x1xf32>
      %67 = vector.broadcast %66 : f32 to vector<1x1xf32>
      %cst_33 = arith.constant 9.53674316E-7 : f32
      %68 = vector.broadcast %cst_33 : f32 to vector<1x1xf32>
      %69 = arith.mulf %67, %68 : vector<1x1xf32>
      %c0_34 = arith.constant 0 : index
      %c0_35 = arith.constant 0 : index
      %70 = vector.load %arg3[%c0_34, %c0_35] : memref<1x1xf32, #tpu.memory_space<vmem>>, vector<1x1xf32>
      tpu.vector_store %arg3[%c0_34, %c0_35], %69 {strides = array<i32>} : memref<1x1xf32, #tpu.memory_space<vmem>>, vector<1x1xf32>,
    } else {
    }
    return
  }
  func.func @transform_0(%arg0: i32) -> (i32, i32) {
    %c0_i32 = arith.constant 0 : i32
    %c0_i32_0 = arith.constant 0 : i32
    return %c0_i32, %arg0 : i32, i32
  }
  func.func @transform_1(%arg0: i32) -> (i32, i32) {
    %c0_i32 = arith.constant 0 : i32
    %c0_i32_0 = arith.constant 0 : i32
    return %c0_i32, %arg0 : i32, i32
  }
  func.func @transform_2(%arg0: i32) -> (i32, i32) {
    %c0_i32 = arith.constant 0 : i32
    %c0_i32_0 = arith.constant 0 : i32
    %c0_i32_1 = arith.constant 0 : i32
    return %c0_i32, %c0_i32_0 : i32, i32
  }
}

</mosaic_0001>

<bundles_post_ra>
// kernel: tpu_custom_call.1
= control target key start
LH: loop header
LB: loop body
LE: loop exit
PB: predicated region body
PF: predicated region fallthrough
CT: control target
= control target key end

     0   :  { %7 = vsyncpa [#allocation5], 0  ;;  %s810_s0 = inlined_call_operand.hbm [shape: f32[2,1024], index: 0, kind: input, shape index: {}]   ;;  %s811_s1 = inlined_call_operand.hbm [shape: f32[2,1024], index: 1, kind: input, shape index: {}]   ;;  %s812_s2 = inlined_call_operand.hbm [shape: f32[1,1], index: 2, kind: output, shape index: {}]  }
   0x1   :  { %8 = vsyncpa [#allocation8], 0 }
   0x2   :  { %9 = vsyncpa [#allocation6], 0  ;;  %s15_s11 = sshll.u32 %s810_s0, 4  ;;  %s737_s12 = smov [#allocation4]   ;;  %s16_s11 = int_to_ptr.hbm [resolvable:$true] %s15_s11 }
   0x3   :  { %s17_s13 = sshll.u32 %s737_s12, 4  ;;  %s26_s16 = sshll.u32 %s811_s1, 4  ;;  %s18_s13 = int_to_ptr.vmem [resolvable:$true] %s17_s13  ;;  %s27_s16 = int_to_ptr.hbm [resolvable:$true] %s26_s16 }
   0x4   :  { %20 = dma.hbm_to_vmem [thread:$0]  %s16_s11, 256, %s18_s13, [#allocation5]  }
   0x5   :  { %s738_s17 = smov [#allocation7]  }
   0x6   :  { %s28_s18 = sshll.u32 %s738_s17, 4  ;;  %s29_s18 = int_to_ptr.vmem [resolvable:$true] %s28_s18 }
   0x7   :  { %31 = dma.hbm_to_vmem [thread:$0]  %s27_s16, 256, %s29_s18, [#allocation8]  }
   0x8   :  { %731 = dma.done.wait [#allocation5], 256  }
   0x9   :  { %732 = vsyncadd [#allocation5], 4294967040 }
   0xa   :  { %733 = dma.done.wait [#allocation8], 256  }
   0xb   :  { %734 = vsyncadd [#allocation8], 4294967040  ;;  %v47_v0 = vld [vmem:[#allocation4] sm:$0xff]  ;;  %v48_v1 = vld [vmem:[#allocation4 + $0x8] sm:$0xff]  ;;  %vm44_vm0 = vcmask 9216   ;;  %v739_v36 = vmov 0.0   ;;  %v463_v54 = vlaneseq }
   0xc   :  { %52 = vst [vmem:[#allocation1] ss:$4 sm:$0xff] %v47_v0  ;;  %v253_v10 = vld [vmem:[#allocation7] sm:$0xff]  ;;  %v254_v15 = vld [vmem:[#allocation7 + $0x8] sm:$0xff]  ;;  %s740_s0 = smov [#allocation9]   ;;  %s626_s21 = sshll.u32 %s812_s2, 4  ;;  %s627_s21 = int_to_ptr.hbm [resolvable:$true] %s626_s21 }
   0xd   :  { %54 = vst [vmem:[#allocation1 + $0x20] ss:$4 sm:$0xff] %v48_v1  ;;  %v464_v57 = vshrl.u32 %v463_v54, 7  ;;  %v466_v58 = vand.u32 127, %v463_v54  ;;  %s624_s1 = sshll.u32 %s740_s0, 4  ;;  %s625_s1 = int_to_ptr.vmem [resolvable:$true] %s624_s1 }
   0xe   :  { %45 = vst.msk [vmem:[#allocation2] sm:$0x3] %vm44_vm0, %v739_v36 }
   0xf   :  { %46 = vst.msk [vmem:[#allocation3] sm:$0x3] %vm44_vm0, %v739_v36  ;;  %vm467_vm1 = vcmp.eq.s32.totalorder %v464_v57, %v466_v58 }
  0x13   :  { %v55_v2 = vld.sshfl [vmem:[#allocation1] sm:$0xff pattern:$0x73625140]  ;;  %v56_v3 = vld.sshfl [vmem:[#allocation1 + $0x8] sm:$0xff pattern:$0x73625140] }
  0x14   :  { %v57_v4 = vld.sshfl [vmem:[#allocation1 + $0x10] sm:$0xff pattern:$0x73625140]  ;;  %v58_v5 = vld.sshfl [vmem:[#allocation1 + $0x18] sm:$0xff pattern:$0x73625140] }
  0x15   :  { %71 = vst [vmem:[#allocation1] ss:$4 sm:$0xff] %v47_v0  ;;  %v59_v6 = vld.sshfl [vmem:[#allocation1 + $0x20] sm:$0xff pattern:$0x73625140] }
  0x16   :  { %v60_v7 = vld.sshfl [vmem:[#allocation1 + $0x28] sm:$0xff pattern:$0x73625140]  ;;  %v61_v8 = vld.sshfl [vmem:[#allocation1 + $0x30] sm:$0xff pattern:$0x73625140] }
  0x17   :  { %v62_v9 = vld.sshfl [vmem:[#allocation1 + $0x38] sm:$0xff pattern:$0x73625140]  ;;  %v49_v51 = vld [vmem:[#allocation2] sm:$0x3] }
  0x18   :  { %73 = vst [vmem:[#allocation1 + $0x20] ss:$4 sm:$0xff] %v48_v1 }
  0x1c   :  { %v76_v11 = vld.sshfl [vmem:[#allocation1 + $0x10] sm:$0xff pattern:$0x73625140]  ;;  %v74_v12 = vld.sshfl [vmem:[#allocation1] sm:$0xff pattern:$0x73625140] }
  0x1d   :  { %145 = vmatpush.xpose.msra.mxu2 %v76_v11  ;;  %105 = vmatpush.xpose.msra.mxu0 %v74_v12  ;;  %v77_v13 = vld.sshfl [vmem:[#allocation1 + $0x18] sm:$0xff pattern:$0x73625140]  ;;  %v75_v14 = vld.sshfl [vmem:[#allocation1 + $0x8] sm:$0xff pattern:$0x73625140] }
  0x1e   :  { %165 = vmatpush.xpose.msra.mxu3 %v77_v13  ;;  %125 = vmatpush.xpose.msra.mxu1 %v75_v14  ;;  %258 = vst [vmem:[#allocation1] ss:$4 sm:$0xff] %v253_v10 }
  0x1f   :  { %v80_v16 = vld.sshfl [vmem:[#allocation1 + $0x30] sm:$0xff pattern:$0x73625140]  ;;  %v78_v17 = vld.sshfl [vmem:[#allocation1 + $0x20] sm:$0xff pattern:$0x73625140] }
  0x20   :  { %146 = vmatmul.f32.vlgmr.msra.gmra.mxu2 %v57_v4  ;;  %106 = vmatmul.f32.vlgmr.msra.gmra.mxu0 %v55_v2  ;;  %v81_v18 = vld.sshfl [vmem:[#allocation1 + $0x38] sm:$0xff pattern:$0x73625140]  ;;  %v79_v19 = vld.sshfl [vmem:[#allocation1 + $0x28] sm:$0xff pattern:$0x73625140] }
  0x21   :  { %166 = vmatmul.f32.vlgmr.msra.gmra.mxu3 %v58_v5  ;;  %126 = vmatmul.f32.vlgmr.msra.gmra.mxu1 %v56_v3  ;;  %260 = vst [vmem:[#allocation1 + $0x20] ss:$4 sm:$0xff] %v254_v15 }
  0x22   :  { %225 = vmatpush.xpose.msrb.mxu2 %v80_v16  ;;  %185 = vmatpush.xpose.msrb.mxu0 %v78_v17 }
  0x23   :  { %245 = vmatpush.xpose.msrb.mxu3 %v81_v18  ;;  %205 = vmatpush.xpose.msrb.mxu1 %v79_v19 }
  0x25   :  { %v261_v20 = vld.sshfl [vmem:[#allocation1] sm:$0xff pattern:$0x73625140]  ;;  %v262_v21 = vld.sshfl [vmem:[#allocation1 + $0x8] sm:$0xff pattern:$0x73625140] }
  0x26   :  { %v263_v22 = vld.sshfl [vmem:[#allocation1 + $0x10] sm:$0xff pattern:$0x73625140]  ;;  %v264_v23 = vld.sshfl [vmem:[#allocation1 + $0x18] sm:$0xff pattern:$0x73625140] }
  0x27   :  { %277 = vst [vmem:[#allocation1] ss:$4 sm:$0xff] %v253_v10  ;;  %v255_v10 = vld [vmem:[#allocation3] sm:$0x3] }
  0x28   :  { %226 = vmatmul.f32.vlgmr.msrb.gmra.mxu2 %v61_v8  ;;  %v265_v24 = vld.sshfl [vmem:[#allocation1 + $0x20] sm:$0xff pattern:$0x73625140]  ;;  %v266_v25 = vld.sshfl [vmem:[#allocation1 + $0x28] sm:$0xff pattern:$0x73625140]  ;;  %186 = vmatmul.f32.vlgmr.msrb.gmra.mxu0 %v59_v6 }
  0x29   :  { %v267_v26 = vld.sshfl [vmem:[#allocation1 + $0x30] sm:$0xff pattern:$0x73625140]  ;;  %v268_v27 = vld.sshfl [vmem:[#allocation1 + $0x38] sm:$0xff pattern:$0x73625140]  ;;  %246 = vmatmul.f32.vlgmr.msrb.gmra.mxu3 %v62_v9  ;;  %206 = vmatmul.f32.vlgmr.msrb.gmra.mxu1 %v60_v7 }
  0x2a   :  { %279 = vst [vmem:[#allocation1 + $0x20] ss:$4 sm:$0xff] %v254_v15 }
  0x2e   :  { %v282_v28 = vld.sshfl [vmem:[#allocation1 + $0x10] sm:$0xff pattern:$0x73625140]  ;;  %v280_v29 = vld.sshfl [vmem:[#allocation1] sm:$0xff pattern:$0x73625140] }
  0x2f   :  { %351 = vmatpush.xpose.msra.mxu2 %v282_v28  ;;  %311 = vmatpush.xpose.msra.mxu0 %v280_v29  ;;  %v283_v30 = vld.sshfl [vmem:[#allocation1 + $0x18] sm:$0xff pattern:$0x73625140]  ;;  %v281_v31 = vld.sshfl [vmem:[#allocation1 + $0x8] sm:$0xff pattern:$0x73625140] }
  0x30   :  { %371 = vmatpush.xpose.msra.mxu3 %v283_v30  ;;  %331 = vmatpush.xpose.msra.mxu1 %v281_v31 }
  0x31   :  { %v286_v32 = vld.sshfl [vmem:[#allocation1 + $0x30] sm:$0xff pattern:$0x73625140]  ;;  %v284_v33 = vld.sshfl [vmem:[#allocation1 + $0x20] sm:$0xff pattern:$0x73625140] }
  0x32   :  { %352 = vmatmul.f32.vlgmr.msra.gmra.mxu2 %v263_v22  ;;  %312 = vmatmul.f32.vlgmr.msra.gmra.mxu0 %v261_v20  ;;  %v287_v34 = vld.sshfl [vmem:[#allocation1 + $0x38] sm:$0xff pattern:$0x73625140]  ;;  %v285_v35 = vld.sshfl [vmem:[#allocation1 + $0x28] sm:$0xff pattern:$0x73625140] }
  0x33   :  { %372 = vmatmul.f32.vlgmr.msra.gmra.mxu3 %v264_v23  ;;  %332 = vmatmul.f32.vlgmr.msra.gmra.mxu1 %v262_v21 }
  0x34   :  { %431 = vmatpush.xpose.msrb.mxu2 %v286_v32  ;;  %391 = vmatpush.xpose.msrb.mxu0 %v284_v33 }
  0x35   :  { %451 = vmatpush.xpose.msrb.mxu3 %v287_v34  ;;  %411 = vmatpush.xpose.msrb.mxu1 %v285_v35 }
  0x3a   :  { %432 = vmatmul.f32.vlgmr.msrb.gmra.mxu2 %v267_v26  ;;  %392 = vmatmul.f32.vlgmr.msrb.gmra.mxu0 %v265_v24 }
  0x3b   :  { %452 = vmatmul.f32.vlgmr.msrb.gmra.mxu3 %v268_v27  ;;  %412 = vmatmul.f32.vlgmr.msrb.gmra.mxu1 %v266_v25 }
  0x9d   :  { %v107_v37 = vpop.f32.mrf.mxu0 }
  0x9e   :  { %v127_v38 = vpop.f32.mrf.mxu1 }
  0x9f   :  { %v128_v39 = vadd.f32 %v127_v38, %v107_v37 }
  0xa3   :  { %v147_v40 = vpop.f32.mrf.mxu2 }
  0xa4   :  { %v148_v41 = vadd.f32 %v147_v40, %v128_v39  ;;  %v167_v42 = vpop.f32.mrf.mxu3 }
  0xa5   :  { %v187_v43 = vpop.f32.mrf.mxu0 }
  0xa6   :  { %v168_v44 = vadd.f32 %v167_v42, %v148_v41  ;;  %v207_v45 = vpop.f32.mrf.mxu1 }
  0xa8   :  { %v188_v46 = vadd.f32 %v187_v43, %v168_v44 }
  0xaa   :  { %v208_v47 = vadd.f32 %v207_v45, %v188_v46 }
  0xab   :  { %v227_v48 = vpop.f32.mrf.mxu2 }
  0xac   :  { %v228_v49 = vadd.f32 %v227_v48, %v208_v47  ;;  %v247_v50 = vpop.f32.mrf.mxu3 }
  0xae   :  { %v248_v52 = vadd.f32 %v247_v50, %v228_v49 }
  0xaf   :  { %v313_v53 = vpop.f32.mrf.mxu0 }
  0xb0   :  { %v250_v55 = vadd.f32 %v248_v52, %v49_v51  ;;  %v333_v56 = vpop.f32.mrf.mxu1 }
  0xb1   :  { %v334_v59 = vadd.f32 %v333_v56, %v313_v53 }
  0xb2   :  { %252 = vst.msk [vmem:[#allocation2] sm:$0x3] %vm44_vm0, %v250_v55 }
  0xb5   :  { %v353_v60 = vpop.f32.mrf.mxu2 }
  0xb6   :  { %v354_v61 = vadd.f32 %v353_v60, %v334_v59  ;;  %v373_v62 = vpop.f32.mrf.mxu3 }
  0xb7   :  { %v393_v63 = vpop.f32.mrf.mxu0 }
  0xb8   :  { %v374_v0 = vadd.f32 %v373_v62, %v354_v61  ;;  %v413_v1 = vpop.f32.mrf.mxu1 }
  0xb9   :  { %v765_v2 = vld [vmem:[#allocation2] sm:$0x3] }
  0xba   :  { %v394_v3 = vadd.f32 %v393_v63, %v374_v0  ;;  %v468_v4 = vsel %vm467_vm1, %v765_v2, 0.0 }
  0xbb   :  { %v469_v5 = vsel %vm44_vm0, %v468_v4, 0.0 }
  0xbc   :  { %v414_v6 = vadd.f32 %v413_v1, %v394_v3  ;;  %470 = vadd.xlane.f32.xlu0 %v469_v5  ;;  %v472_v16 = vrot.slane %v469_v5, 4 }
  0xbd   :  { %v433_v7 = vpop.f32.mrf.mxu2 }
  0xbe   :  { %v434_v8 = vadd.f32 %v433_v7, %v414_v6  ;;  %v453_v9 = vpop.f32.mrf.mxu3  ;;  %v473_v17 = vadd.f32 %v472_v16, %v469_v5 }
  0xc0   :  { %v454_v11 = vadd.f32 %v453_v9, %v434_v8  ;;  %v474_v19 = vrot.slane %v473_v17, 2 }
  0xc2   :  { %v456_v12 = vadd.f32 %v454_v11, %v255_v10  ;;  %v475_v21 = vadd.f32 %v474_v19, %v473_v17 }
  0xc4   :  { %457 = vst.msk [vmem:[#allocation3] sm:$0x3] %vm44_vm0, %v456_v12  ;;  %v476_v23 = vrot.slane %v475_v21, 1 }
  0xc6   :  { %v477_v25 = vadd.f32 %v476_v23, %v475_v21 }
  0xc8   :  { %643 = vrsqrt.f32 %v477_v25  ;;  %vm523_vm2 = vcmp.eq.f32.partialorder %v477_v25, inf  ;;  %v526_v49 = vand.u32 2147483648, %v477_v25  ;;  %vm525_vm3 = vcmp.eq.f32.partialorder %v477_v25, 0.0 }
  0xcb   :  { %v771_v13 = vld [vmem:[#allocation3] sm:$0x3] }
  0xcc   :  { %v478_v14 = vsel %vm467_vm1, %v771_v13, 0.0 }
  0xcd   :  { %v479_v15 = vsel %vm44_vm0, %v478_v14, 0.0 }
  0xce   :  { %480 = vadd.xlane.f32.xlu0 %v479_v15  ;;  %v482_v18 = vrot.slane %v479_v15, 4  ;;  %v644_v28 = vpop.eup %643 }
  0xcf   :  { %v517_v29 = vmul.f32 %v644_v28, %v477_v25 }
  0xd0   :  { %v483_v20 = vadd.f32 %v482_v18, %v479_v15 }
  0xd1   :  { %v518_v31 = vmul.f32 %v644_v28, %v517_v29 }
  0xd2   :  { %v484_v22 = vrot.slane %v483_v20, 2 }
  0xd3   :  { %v519_v33 = vmul.f32 0.5, %v518_v31 }
  0xd4   :  { %v485_v24 = vadd.f32 %v484_v22, %v483_v20 }
  0xd5   :  { %v520_v36 = vsub.f32 1.5, %v519_v33 }
  0xd6   :  { %v486_v26 = vrot.slane %v485_v24, 1 }
  0xd7   :  { %v521_v39 = vmul.f32 %v644_v28, %v520_v36 }
  0xd8   :  { %v487_v27 = vadd.f32 %v486_v26, %v485_v24 }
  0xd9   :  { %v522_v43 = vmul.f32 %v521_v39, %v477_v25 }
  0xda   :  { %645 = vrsqrt.f32 %v487_v27  ;;  %vm580_vm5 = vcmp.eq.f32.partialorder %v487_v27, inf  ;;  %v583_v59 = vand.u32 2147483648, %v487_v27  ;;  %vm582_vm7 = vcmp.eq.f32.partialorder %v487_v27, 0.0 }
  0xdb   :  { %v524_v47 = vsel %vm523_vm2, %v477_v25, %v522_v43 }
  0xdc   :  { %v527_v53 = vsel %vm525_vm3, %v526_v49, %v524_v47 }
  0xdd   :  { %v776_v58 = vadd.f32 1e-06, %v527_v53 }
  0xdf   :  { %vm534_vm12 = vweird.f32 %v776_v58  ;;  %v538_v33 = vand.u32 2147483647, %v776_v58 }
  0xe0   :  { %v646_v30 = vpop.eup %645 }
  0xe1   :  { %v574_v32 = vmul.f32 %v646_v30, %v487_v27 }
  0xe3   :  { %v575_v35 = vmul.f32 %v646_v30, %v574_v32 }
  0xe5   :  { %v576_v37 = vmul.f32 0.5, %v575_v35 }
  0xe7   :  { %v577_v41 = vsub.f32 1.5, %v576_v37 }
  0xe9   :  { %v578_v45 = vmul.f32 %v646_v30, %v577_v41 }
  0xeb   :  { %v579_v50 = vmul.f32 %v578_v45, %v487_v27 }
  0xed   :  { %v581_v56 = vsel %vm580_vm5, %v487_v27, %v579_v50 }
  0xee   :  { %v584_v61 = vsel %vm582_vm7, %v583_v59, %v581_v56 }
  0xef   :  { %v779_v0 = vadd.f32 1e-06, %v584_v61 }
  0xf1   :  { %vm591_vm1 = vweird.f32 %v779_v0  ;;  %v597_v41 = vand.u32 2147483648, %v779_v0 }
  0xf3   :  { %v598_v50 = vor.u32 1.1754944e-38, %v597_v41 }
 0x12f   :  { %v471_v34 = vpop.xlane.xlu0 %470 }
 0x130   :  { %647 = vrsqrt.f32 %v471_v34  ;;  %vm495_vm4 = vcmp.eq.f32.partialorder %v471_v34, inf  ;;  %v498_v54 = vand.u32 2147483648, %v471_v34  ;;  %vm497_vm6 = vcmp.eq.f32.partialorder %v471_v34, 0.0 }
 0x136   :  { %v648_v38 = vpop.eup %647 }
 0x137   :  { %v489_v40 = vmul.f32 %v648_v38, %v471_v34 }
 0x139   :  { %v490_v42 = vmul.f32 %v648_v38, %v489_v40  ;;  %v595_v40 = vand.u32 2147483647, %v779_v0 }
 0x13b   :  { %v491_v44 = vmul.f32 0.5, %v490_v42 }
 0x13d   :  { %v492_v46 = vsub.f32 1.5, %v491_v44 }
 0x13f   :  { %v493_v48 = vmul.f32 %v648_v38, %v492_v46 }
 0x141   :  { %v494_v51 = vmul.f32 %v493_v48, %v471_v34  ;;  %v481_v52 = vpop.xlane.xlu0 %480 }
 0x142   :  { %649 = vrsqrt.f32 %v481_v52  ;;  %vm552_vm8 = vcmp.eq.f32.partialorder %v481_v52, inf  ;;  %v555_v12 = vand.u32 2147483648, %v481_v52  ;;  %vm554_vm9 = vcmp.eq.f32.partialorder %v481_v52, 0.0 }
 0x143   :  { %v496_v55 = vsel %vm495_vm4, %v471_v34, %v494_v51  ;;  %651 = vrcp.f32 %v776_v58  ;;  %v540_v34 = vand.u32 2147483648, %v776_v58 }
 0x144   :  { %v499_v57 = vsel %vm497_vm6, %v498_v54, %v496_v55  ;;  %vm539_vm6 = vcmp.eq.f32.partialorder %v538_v33, 8.507059e+37 }
 0x145   :  { %v500_v60 = vadd.f32 1e-06, %v499_v57  ;;  %v541_v45 = vor.u32 1.1754944e-38, %v540_v34 }
 0x147   :  { %653 = vrcp.f32 %v500_v60  ;;  %v512_v27 = vand.u32 2147483648, %v500_v60  ;;  %vm506_vm13 = vweird.f32 %v500_v60  ;;  %v510_v28 = vand.u32 2147483647, %v500_v60 }
 0x148   :  { %v650_v62 = vpop.eup %649  ;;  %655 = vrcp.f32 %v779_v0 }
 0x149   :  { %v546_v63 = vmul.f32 %v650_v62, %v481_v52  ;;  %v652_v4 = vpop.eup %651  ;;  %v513_v38 = vor.u32 1.1754944e-38, %v512_v27  ;;  %vm511_vm3 = vcmp.eq.f32.partialorder %v510_v28, 8.507059e+37 }
 0x14a   :  { %v530_v8 = vmul.f32 %v652_v4, %v776_v58  ;;  %vm535_vm10 = vweird.f32 %v652_v4 }
 0x14b   :  { %v547_v1 = vmul.f32 %v650_v62, %v546_v63  ;;  %vm785_vm14 = vmor %vm534_vm12, %vm535_vm10  ;;  %vm596_vm10 = vcmp.eq.f32.partialorder %v595_v40, 8.507059e+37 }
 0x14c   :  { %v531_v15 = vsub.f32 1.0, %v530_v8 }
 0x14d   :  { %v548_v3 = vmul.f32 0.5, %v547_v1  ;;  %v654_v5 = vpop.eup %653 }
 0x14e   :  { %v502_v9 = vmul.f32 %v654_v5, %v500_v60  ;;  %v656_v10 = vpop.eup %655  ;;  %v532_v20 = vmul.f32 %v652_v4, %v531_v15  ;;  %vm507_vm11 = vweird.f32 %v654_v5 }
 0x14f   :  { %v549_v6 = vsub.f32 1.5, %v548_v3  ;;  %v587_v18 = vmul.f32 %v656_v10, %v779_v0  ;;  %vm789_vm15 = vmor %vm506_vm13, %vm507_vm11  ;;  %vm592_vm2 = vweird.f32 %v656_v10  ;;  %vm617_vm11 = vcmask 0  }
 0x150   :  { %v503_v17 = vsub.f32 1.0, %v502_v9  ;;  %v533_v23 = vadd.f32 %v652_v4, %v532_v20  ;;  %vm593_vm5 = vmor %vm591_vm1, %vm592_vm2 }
 0x151   :  { %v550_v7 = vmul.f32 %v650_v62, %v549_v6  ;;  %v588_v22 = vsub.f32 1.0, %v587_v18 }
 0x152   :  { %v504_v21 = vmul.f32 %v654_v5, %v503_v17  ;;  %v537_v32 = vsel %vm785_vm14, %v652_v4, %v533_v23 }
 0x153   :  { %v551_v11 = vmul.f32 %v550_v7, %v481_v52  ;;  %v589_v25 = vmul.f32 %v656_v10, %v588_v22  ;;  %v542_v48 = vsel %vm539_vm6, %v541_v45, %v537_v32 }
 0x154   :  { %v505_v24 = vadd.f32 %v654_v5, %v504_v21 }
 0x155   :  { %v553_v14 = vsel %vm552_vm8, %v481_v52, %v551_v11  ;;  %v590_v37 = vadd.f32 %v656_v10, %v589_v25 }
 0x156   :  { %v556_v16 = vsel %vm554_vm9, %v555_v12, %v553_v14  ;;  %v509_v35 = vsel %vm789_vm15, %v654_v5, %v505_v24 }
 0x157   :  { %v557_v19 = vadd.f32 1e-06, %v556_v16  ;;  %v514_v44 = vsel %vm511_vm3, %v513_v38, %v509_v35  ;;  %v594_v47 = vsel %vm593_vm5, %v656_v10, %v590_v37 }
 0x158   :  { %v544_v51 = vmul.f32 %v542_v48, %v514_v44  ;;  %v599_v54 = vsel %vm596_vm10, %v598_v50, %v594_v47 }
 0x159   :  { %657 = vrcp.f32 %v557_v19  ;;  %v569_v39 = vand.u32 2147483648, %v557_v19  ;;  %v567_v43 = vand.u32 2147483647, %v557_v19  ;;  %vm563_vm7 = vweird.f32 %v557_v19 }
 0x15a   :  { %v602_v56 = vmul.f32 %v544_v51, %v765_v2 }
 0x15b   :  { %v570_v49 = vor.u32 1.1754944e-38, %v569_v39  ;;  %vm568_vm9 = vcmp.eq.f32.partialorder %v567_v43, 8.507059e+37 }
 0x15f   :  { %v658_v26 = vpop.eup %657 }
 0x160   :  { %v559_v30 = vmul.f32 %v658_v26, %v557_v19  ;;  %vm564_vm4 = vweird.f32 %v658_v26 }
 0x161   :  { %vm565_vm8 = vmor %vm563_vm7, %vm564_vm4 }
 0x162   :  { %v560_v36 = vsub.f32 1.0, %v559_v30 }
 0x164   :  { %v561_v42 = vmul.f32 %v658_v26, %v560_v36 }
 0x166   :  { %v562_v46 = vadd.f32 %v658_v26, %v561_v42 }
 0x168   :  { %v566_v52 = vsel %vm565_vm8, %v658_v26, %v562_v46 }
 0x169   :  { %v571_v53 = vsel %vm568_vm9, %v570_v49, %v566_v52 }
 0x16a   :  { %v601_v55 = vmul.f32 %v599_v54, %v571_v53 }
 0x16c   :  { %v603_v57 = vmul.f32 %v601_v55, %v771_v13 }
 0x16e   :  { %v604_v58 = vmul.f32 %v603_v57, %v602_v56 }
 0x170   :  { %v605_v59 = vsel %vm44_vm0, %v604_v58, 0.0 }
 0x171   :  { %606 = vadd.xlane.f32.xlu1 %v605_v59 }
 0x1e4   :  { %v607_v60 = vpop.xlane.xlu1 %606 }
 0x1e5   :  { %v608_v61 = vrot.slane %v607_v60, 4 }
 0x1e7   :  { %v609_v62 = vadd.f32 %v608_v61, %v607_v60 }
 0x1e9   :  { %v610_v63 = vrot.slane %v609_v62, 2 }
 0x1eb   :  { %v611_v0 = vadd.f32 %v610_v63, %v609_v62 }
 0x1ed   :  { %v612_v1 = vrot.slane %v611_v0, 1 }
 0x1ef   :  { %v613_v3 = vadd.f32 %v612_v1, %v611_v0 }
 0x1f1   :  { %637 = vpush %v613_v3 }
 0x222   :  { %s638_s22 = spop %637 }
 0x223   :  { %v615_v2 = vstv %s638_s22 }
 0x224   :  { %v616_v13 = vmul.f32 9.536743e-07, %v615_v2 }
 0x226   :  { %618 = vst.msk [vmem:[#allocation9] sm:$0x1] %vm617_vm11, %v616_v13 }
 0x227   :  { %629 = dma.vmem_to_hbm [thread:$0]  %s625_s1, 16, %s627_s21, [#allocation6]  }
 0x228   :  { %735 = dma.done.wait [#allocation6], 16  }
 0x229   :  { %736 = vsyncadd [#allocation6], 4294967280 }
 0x22a   :  { %634 = vsyncpa [#allocation5], 1 }
 0x22b   :  { %635 = vsyncpa [#allocation8], 1 }
 0x22c   :  { %636 = vsyncpa [#allocation6], 1 }

</bundles_post_ra>
